<compile_context>
chip_gen: v7x
topology: tpu7x:2x2x1
jax: 0.10.0
libtpu: 0.0.40
codegen_flags: <defaults>
</compile_context>

<pallas_src>
import math

import jax
import jax.numpy as jnp
from jax.experimental import pallas as pl
from jax.experimental.pallas import tpu as pltpu  # noqa: F401  (TPU backend)

BATCH = 2
SEQ = 8
IN_FEATURES = 512
OUT_FEATURES = 768
EPS = 1e-5  # nn.LayerNorm default


def feature_projection_kernel(x_ref, w_ref, b_ref, out_ref):
    """normalize(x) @ W' + b'  for a (rows, IN_FEATURES) slab resident in VMEM.

    x_ref : (rows, IN_FEATURES) f32
    w_ref : (IN_FEATURES, OUT_FEATURES) bf16   (gamma already folded in)
    b_ref : (1, OUT_FEATURES) f32              (beta @ W + bias folded in)
    """
    x = x_ref[...]                                  # (rows, D) f32
    inv_d = 1.0 / x.shape[-1]

    # Two independent cross-lane reductions (co-issue on XLU), then
    # var = E[x^2] - mu^2  (biased, matching PyTorch LayerNorm).
    mu = jnp.sum(x, axis=-1, keepdims=True) * inv_d
    ex2 = jnp.sum(x * x, axis=-1, keepdims=True) * inv_d
    var = ex2 - mu * mu

    # Normalize (affine folded into W'/b'); rsqrt goes to the EUP slot.
    xn = (x - mu) * jax.lax.rsqrt(var + EPS)

    # bf16 MXU matmul with f32 accumulation + folded bias.
    y = xn.astype(jnp.bfloat16)
    out = jnp.dot(y, w_ref[...], preferred_element_type=jnp.float32) + b_ref[...]

    # Dropout is identity in eval mode.
    out_ref[...] = out.astype(out_ref.dtype)


def fold_layernorm_into_projection(gamma, beta, weight_oi, bias):
    """One-time (offline) parameter prep.

    gamma, beta : (IN_FEATURES,) LayerNorm affine params (f32)
    weight_oi   : (OUT_FEATURES, IN_FEATURES) -- PyTorch nn.Linear.weight layout
    bias        : (OUT_FEATURES,)

    Returns:
      w_folded : (IN_FEATURES, OUT_FEATURES) bf16  == gamma[:,None] * W^T
      b_folded : (1, OUT_FEATURES) f32             == bias + beta @ W^T
    """
    w_io = weight_oi.T.astype(jnp.float32)                      # (in, out)
    w_folded = (gamma.astype(jnp.float32)[:, None] * w_io).astype(jnp.bfloat16)
    b_folded = (bias.astype(jnp.float32)
                + beta.astype(jnp.float32) @ w_io).reshape(1, OUT_FEATURES)
    return w_folded, b_folded


@jax.jit
def feature_projection(x, w_folded, b_folded):
    """x: (B, S, IN_FEATURES) f32 -> (B, S, OUT_FEATURES) f32."""
    B, S, D = x.shape
    rows = B * S
    x2 = x.reshape(rows, D)                         # fold batch into matmul rows

    cost = pl.CostEstimate(
        flops=2 * rows * D * OUT_FEATURES,
        transcendentals=rows,                        # one rsqrt per row
        bytes_accessed=(rows * D * 4                 # x (f32)
                        + D * OUT_FEATURES * 2       # W (bf16)  -- dominant
                        + OUT_FEATURES * 4           # bias (f32)
                        + rows * OUT_FEATURES * 4),  # out (f32)
    )

    out = pl.pallas_call(
        feature_projection_kernel,
        out_shape=jax.ShapeDtypeStruct((rows, OUT_FEATURES), x.dtype),
        in_specs=[
            pl.BlockSpec((rows, D), lambda *_: (0, 0)),
            pl.BlockSpec((D, OUT_FEATURES), lambda *_: (0, 0)),
            pl.BlockSpec((1, OUT_FEATURES), lambda *_: (0, 0)),
        ],
        out_specs=pl.BlockSpec((rows, OUT_FEATURES), lambda *_: (0, 0)),
        cost_estimate=cost,
    )(x2, w_folded, b_folded)

    return out.reshape(B, S, OUT_FEATURES)


if __name__ == "__main__":
    key = jax.random.PRNGKey(0)
    kx, kw, kb, kg, kbeta = jax.random.split(key, 5)

    x = jax.random.normal(kx, (BATCH, SEQ, IN_FEATURES), jnp.float32)

    # LayerNorm params (nontrivial so the affine fold is exercised).
    gamma = 1.0 + 0.1 * jax.random.normal(kg, (IN_FEATURES,), jnp.float32)
    beta = 0.1 * jax.random.normal(kbeta, (IN_FEATURES,), jnp.float32)

    # Linear params, PyTorch nn.Linear layout (out, in) and uniform init.
    bound = 1.0 / math.sqrt(IN_FEATURES)
    weight_oi = jax.random.uniform(kw, (OUT_FEATURES, IN_FEATURES), jnp.float32,
                                   minval=-bound, maxval=bound)
    bias = jax.random.uniform(kb, (OUT_FEATURES,), jnp.float32,
                              minval=-bound, maxval=bound)

    # One-time offline fold (done at checkpoint-load time in real use).
    w_folded, b_folded = fold_layernorm_into_projection(gamma, beta, weight_oi, bias)

    out = feature_projection(x, w_folded, b_folded)
    jax.block_until_ready(out)

    # --- Reference 1: exact same low-precision path in pure JAX (tight check).
    mu = x.mean(axis=-1, keepdims=True)
    ex2 = (x * x).mean(axis=-1, keepdims=True)
    var = ex2 - mu * mu
    xn = (x - mu) * jax.lax.rsqrt(var + EPS)
    ref_lp = (jnp.dot(xn.astype(jnp.bfloat16).reshape(-1, IN_FEATURES),
                      w_folded, preferred_element_type=jnp.float32)
              + b_folded).reshape(BATCH, SEQ, OUT_FEATURES)

    # --- Reference 2: full f32 PyTorch semantics (loose check, bf16 roundoff).
    var_t = ((x - mu) ** 2).mean(axis=-1, keepdims=True)
    ln = (x - mu) * jax.lax.rsqrt(var_t + EPS) * gamma + beta
    ref_f32 = ln @ weight_oi.T + bias

    assert out.shape == (BATCH, SEQ, OUT_FEATURES)
    assert bool(jnp.all(jnp.isfinite(out)))
    assert bool(jnp.allclose(out, ref_lp, atol=1e-4, rtol=1e-4)), \
        float(jnp.max(jnp.abs(out - ref_lp)))
    assert bool(jnp.allclose(out, ref_f32, atol=2e-2, rtol=2e-2)), \
        float(jnp.max(jnp.abs(out - ref_f32)))
    print("KERNEL_OK")
</pallas_src>

<mosaic_0001>
module attributes {stable_mosaic.version = 11 : i64} {
  func.func @feature_projection_kernel(%arg0: memref<16x512xf32, #tpu.memory_space<vmem>>, %arg1: memref<512x768xbf16, #tpu.memory_space<vmem>>, %arg2: memref<1x768xf32, #tpu.memory_space<vmem>>, %arg3: memref<16x768xf32, #tpu.memory_space<vmem>>) attributes {dimension_semantics = [], scalar_prefetch = 0 : i64, scratch_operands = 0 : i64, tpu.core_type = #tpu.core_type<tc>} {
    %c0 = arith.constant 0 : index
    %c0_0 = arith.constant 0 : index
    %0 = vector.load %arg0[%c0, %c0_0] : memref<16x512xf32, #tpu.memory_space<vmem>>, vector<16x512xf32>
    %cst = arith.constant dense<0.000000e+00> : vector<16xf32>
    %1 = vector.multi_reduction <add>, %0, %cst [1] : vector<16x512xf32> to vector<16xf32>
    %2 = vector.shape_cast %1 : vector<16xf32> to vector<16x1xf32>
    %cst_1 = arith.constant 0.001953125 : f32
    %3 = vector.broadcast %cst_1 : f32 to vector<16x1xf32>
    %4 = arith.mulf %2, %3 : vector<16x1xf32>
    %5 = arith.mulf %0, %0 : vector<16x512xf32>
    %cst_2 = arith.constant dense<0.000000e+00> : vector<16xf32>
    %6 = vector.multi_reduction <add>, %5, %cst_2 [1] : vector<16x512xf32> to vector<16xf32>
    %7 = vector.shape_cast %6 : vector<16xf32> to vector<16x1xf32>
    %cst_3 = arith.constant 0.001953125 : f32
    %8 = vector.broadcast %cst_3 : f32 to vector<16x1xf32>
    %9 = arith.mulf %7, %8 : vector<16x1xf32>
    %10 = arith.mulf %4, %4 : vector<16x1xf32>
    %11 = arith.subf %9, %10 : vector<16x1xf32>
    %12 = vector.broadcast %4 : vector<16x1xf32> to vector<16x512xf32>
    %13 = arith.subf %0, %12 : vector<16x512xf32>
    %cst_4 = arith.constant 9.99999974E-6 : f32
    %14 = vector.broadcast %cst_4 : f32 to vector<16x1xf32>
    %15 = arith.addf %11, %14 : vector<16x1xf32>
    %16 = math.rsqrt %15 : vector<16x1xf32>
    %17 = vector.broadcast %16 : vector<16x1xf32> to vector<16x512xf32>
    %18 = arith.mulf %13, %17 : vector<16x512xf32>
    %19 = arith.truncf %18 : vector<16x512xf32> to vector<16x512xbf16>
    %c0_5 = arith.constant 0 : index
    %c0_6 = arith.constant 0 : index
    %20 = vector.load %arg1[%c0_5, %c0_6] : memref<512x768xbf16, #tpu.memory_space<vmem>>, vector<512x768xbf16>
    %cst_7 = arith.constant dense<0.000000e+00> : vector<16x768xf32>
    %21 = tpu.matmul %19, %20, %cst_7 {dimension_numbers = #tpu.dot_dimension_numbers<[1], [0], [0], [1], [0, 0, 1, 1], [], []>} : vector<16x512xbf16>, vector<512x768xbf16>, vector<16x768xf32> -> vector<16x768xf32>
    %c0_8 = arith.constant 0 : index
    %c0_9 = arith.constant 0 : index
    %22 = vector.load %arg2[%c0_8, %c0_9] : memref<1x768xf32, #tpu.memory_space<vmem>>, vector<1x768xf32>
    %23 = vector.broadcast %22 : vector<1x768xf32> to vector<16x768xf32>
    %24 = arith.addf %21, %23 : vector<16x768xf32>
    %c0_10 = arith.constant 0 : index
    %c0_11 = arith.constant 0 : index
    %25 = vector.load %arg3[%c0_10, %c0_11] : memref<16x768xf32, #tpu.memory_space<vmem>>, vector<16x768xf32>
    tpu.vector_store %arg3[%c0_10, %c0_11], %24 {strides = array<i32>} : memref<16x768xf32, #tpu.memory_space<vmem>>, vector<16x768xf32>,
    return
  }
}

</mosaic_0001>

<bundles_post_ra>
// kernel: feature_projection.1
= control target key start
LH: loop header
LB: loop body
LE: loop exit
PB: predicated region body
PF: predicated region fallthrough
CT: control target
= control target key end

     0   :  { %8 = vsyncpa [#allocation3], 0  ;;  %s2303_s0 = inlined_call_operand.hbm [shape: f32[16,512], index: 0, kind: input, shape index: {}]   ;;  %s2304_s1 = inlined_call_operand.hbm [shape: bf16[512,768], index: 1, kind: input, shape index: {}]   ;;  %s2305_s2 = inlined_call_operand.vmem [shape: f32[1,768], index: 2, kind: input, shape index: {}]   ;;  %s2306_s3 = inlined_call_operand.hbm [shape: f32[16,768], index: 3, kind: output, shape index: {}]  }
   0x1   :  { %9 = vsyncpa [#allocation6], 0 }
   0x2   :  { %10 = vsyncpa [#allocation4], 0  ;;  %s2172_s12 = smov [#allocation2]   ;;  %s2100_s16 = scalar_lea.hbm %s2303_s0, 1024 }
   0x3   :  { %s16_s13 = sshll.u32 %s2172_s12, 4  ;;  %p2101_p0 = scmp.ne.s32.totalorder %s2303_s0, %s2100_s16  ;;  %s17_s13 = int_to_ptr.vmem [resolvable:$true] %s16_s13 }
   0x4   :  { %p2104_p1 = scmp.lt.u32.totalorder %s2100_s16, %s2303_s0 }
   0x6   :  { %p2106_p2 = pnand %p2104_p1, %p2101_p0 }
   0x8   :  { %2109 = shalt.err (!%p2106_p2)
}
   0x9   :  { %s2110_s21 = scalar_lea.vmem %s17_s13, 1024  ;;  %p2115_p4 = scmp.lt.s32.totalorder %s17_s13, %s17_s13 }
   0xa   :  { %p2111_p3 = scmp.ne.s32.totalorder %s17_s13, %s2110_s21  ;;  %p2116_p5 = scmp.lt.s32.totalorder %s2110_s21, %s2110_s21 }
   0xc   :  { %p2117_p6 = por %p2116_p5, %p2115_p4 }
   0xe   :  { %p2118_p7 = pnand %p2117_p6, %p2111_p3 }
  0x10   :  { %2121 = shalt.err (!%p2118_p7)
}
  0x11   :  { %s2173_s22 = smov 512   ;;  %s2174_s23 = smov 32  }
  0x12   :  { %22 = dma.hbm_to_vmem [thread:$0]  %s2303_s0, 1024, %s17_s13, [#allocation3], %s2173_s22, %s2173_s22, %s2174_s23  }
  0x13   :  { %s2175_s26 = smov [#allocation5]   ;;  %s2122_s30 = scalar_lea.hbm %s2304_s1, 24576 }
  0x14   :  { %s28_s27 = sshll.u32 %s2175_s26, 4  ;;  %p2123_p8 = scmp.ne.s32.totalorder %s2304_s1, %s2122_s30  ;;  %s29_s27 = int_to_ptr.vmem [resolvable:$true] %s28_s27 }
  0x15   :  { %p2126_p9 = scmp.lt.u32.totalorder %s2122_s30, %s2304_s1 }
  0x17   :  { %p2128_p10 = pnand %p2126_p9, %p2123_p8 }
  0x19   :  { %2131 = shalt.err (!%p2128_p10)
}
  0x1a   :  { %s2132_s8 = scalar_lea.vmem %s29_s27, 24576  ;;  %p2137_p12 = scmp.lt.s32.totalorder %s29_s27, %s29_s27 }
  0x1b   :  { %p2133_p11 = scmp.ne.s32.totalorder %s29_s27, %s2132_s8  ;;  %p2138_p13 = scmp.lt.s32.totalorder %s2132_s8, %s2132_s8 }
  0x1d   :  { %p2139_p0 = por %p2138_p13, %p2137_p12 }
  0x1f   :  { %p2140_p1 = pnand %p2139_p0, %p2133_p11 }
  0x21   :  { %2143 = shalt.err (!%p2140_p1)
}
  0x22   :  { %s2176_s0 = smov 384   ;;  %s2177_s9 = smov 24  }
  0x23   :  { %34 = dma.hbm_to_vmem [thread:$0]  %s2304_s1, 24576, %s29_s27, [#allocation6], %s2176_s0, %s2176_s0, %s2177_s9  }
  0x24   :  { %2166 = dma.done.wait [#allocation3], 1024  }
  0x25   :  { %2167 = vsyncadd [#allocation3], 4294966272 }
  0x26   :  { %2168 = dma.done.wait [#allocation6], 24576  }
  0x27   :  { %2169 = vsyncadd [#allocation6], 4294942720  ;;  %v2225_v0 = vld [vmem:[#allocation2] sm:$0xff]  ;;  %v2227_v1 = vld [vmem:[#allocation2 + $0x8] sm:$0xff] }
  0x28   :  { %v2229_v2 = vld [vmem:[#allocation2 + $0x10] sm:$0xff]  ;;  %v2231_v3 = vld [vmem:[#allocation2 + $0x18] sm:$0xff]  ;;  %v51_v4 = vadd.f32 %v2227_v1, %v2225_v0  ;;  %v63_v5 = vmul.f32 %v2225_v0, %v2225_v0  ;;  %v64_v6 = vmul.f32 %v2227_v1, %v2227_v1  ;;  %v2241_v8 = vld [vmem:[#allocation2 + $0x20] sm:$0xff] }
  0x29   :  { %v65_v7 = vmul.f32 %v2229_v2, %v2229_v2  ;;  %v2243_v9 = vld [vmem:[#allocation2 + $0x28] sm:$0xff]  ;;  %v2245_v10 = vld [vmem:[#allocation2 + $0x30] sm:$0xff]  ;;  %v2247_v11 = vld [vmem:[#allocation2 + $0x38] sm:$0xff]  ;;  %v67_v13 = vmul.f32 %v2241_v8, %v2241_v8  ;;  %v66_v16 = vmul.f32 %v2231_v3, %v2231_v3 }
  0x2a   :  { %v56_v12 = vadd.f32 %v2243_v9, %v2241_v8  ;;  %v68_v14 = vmul.f32 %v2243_v9, %v2243_v9  ;;  %v52_v15 = vadd.f32 %v51_v4, %v2229_v2  ;;  %v71_v17 = vadd.f32 %v64_v6, %v63_v5  ;;  %v1808_v19 = vld [vmem:[#allocation5 + $0x4] ss:$24 sps:$4 sm:$0xff]   ;;  %v1812_v23 = vld [vmem:[#allocation5] ss:$24 sps:$4 sm:$0xff]   ;;  %v1814_v29 = vld [vmem:[#allocation5 + $0x34] ss:$24 sps:$4 sm:$0xff]  }
  0x2b   :  { %v69_v18 = vmul.f32 %v2245_v10, %v2245_v10  ;;  %v1810_v22 = vld [vmem:[#allocation5 + $0x304] ss:$24 sps:$4 sm:$0xff]   ;;  %v70_v26 = vmul.f32 %v2247_v11, %v2247_v11  ;;  %1295 = vmatprep.subr.bf16.mxu1 %v1808_v19  ;;  %v1813_v27 = vld [vmem:[#allocation5 + $0x300] ss:$24 sps:$4 sm:$0xff]   ;;  %v1816_v32 = vld [vmem:[#allocation5 + $0x334] ss:$24 sps:$4 sm:$0xff]  }
  0x2c   :  { %v57_v20 = vadd.f32 %v56_v12, %v2245_v10  ;;  %v76_v21 = vadd.f32 %v68_v14, %v67_v13  ;;  %v53_v24 = vadd.f32 %v52_v15, %v2231_v3  ;;  %v72_v25 = vadd.f32 %v71_v17, %v65_v7  ;;  %1338 = vmatprep.subr.bf16.mxu0 %v1810_v22  ;;  %v1818_v33 = vld [vmem:[#allocation5 + $0x30] ss:$24 sps:$4 sm:$0xff]   ;;  %v1820_v35 = vld [vmem:[#allocation5 + $0x64] ss:$24 sps:$4 sm:$0xff]   ;;  %v1824_v38 = vld [vmem:[#allocation5 + $0x60] ss:$24 sps:$4 sm:$0xff]  }
  0x2d   :  { %1296 = vmatpush1.bf16.msra.mxu1 %v1812_v23  ;;  %1339 = vmatpush1.bf16.msra.mxu0 %v1813_v27  ;;  %v1819_v34 = vld [vmem:[#allocation5 + $0x330] ss:$24 sps:$4 sm:$0xff]   ;;  %v1822_v37 = vld [vmem:[#allocation5 + $0x364] ss:$24 sps:$4 sm:$0xff]   ;;  %v1825_v39 = vld [vmem:[#allocation5 + $0x360] ss:$24 sps:$4 sm:$0xff]  }
  0x2e   :  { %v77_v28 = vadd.f32 %v76_v21, %v69_v18  ;;  %54 = vadd.xlane.f32.xlu0 %v53_v24  ;;  %v73_v30 = vadd.f32 %v72_v25, %v66_v16  ;;  %v58_v31 = vadd.f32 %v57_v20, %v2247_v11  ;;  %1297 = vmatprep.subr.bf16.mxu1 %v1814_v29  ;;  %v1826_v40 = vld [vmem:[#allocation5 + $0x94] ss:$24 sps:$4 sm:$0xff]   ;;  %v1830_v42 = vld [vmem:[#allocation5 + $0x90] ss:$24 sps:$4 sm:$0xff]   ;;  %v1832_v44 = vld [vmem:[#allocation5 + $0xc4] ss:$24 sps:$4 sm:$0xff]  }
  0x2f   :  { %1340 = vmatprep.subr.bf16.mxu0 %v1816_v32  ;;  %v1828_v41 = vld [vmem:[#allocation5 + $0x394] ss:$24 sps:$4 sm:$0xff]   ;;  %v1831_v43 = vld [vmem:[#allocation5 + $0x390] ss:$24 sps:$4 sm:$0xff]   ;;  %v1834_v45 = vld [vmem:[#allocation5 + $0x3c4] ss:$24 sps:$4 sm:$0xff]  }
  0x30   :  { %74 = vadd.xlane.f32.xlu1 %v73_v30  ;;  %v78_v36 = vadd.f32 %v77_v28, %v70_v26  ;;  %v1836_v46 = vld [vmem:[#allocation5 + $0xc0] ss:$24 sps:$4 sm:$0xff]   ;;  %v1838_v48 = vld [vmem:[#allocation5 + $0xf4] ss:$24 sps:$4 sm:$0xff]   ;;  %v1842_v50 = vld [vmem:[#allocation5 + $0xf0] ss:$24 sps:$4 sm:$0xff]  }
  0x31   :  { %1298 = vmatpush1.bf16.msra.mxu1 %v1818_v33  ;;  %1341 = vmatpush1.bf16.msra.mxu0 %v1819_v34  ;;  %v1837_v47 = vld [vmem:[#allocation5 + $0x3c0] ss:$24 sps:$4 sm:$0xff]   ;;  %v1840_v49 = vld [vmem:[#allocation5 + $0x3f4] ss:$24 sps:$4 sm:$0xff]   ;;  %v1843_v51 = vld [vmem:[#allocation5 + $0x3f0] ss:$24 sps:$4 sm:$0xff]  }
  0x32   :  { %59 = vadd.xlane.f32.xlu0 %v58_v31  ;;  %1299 = vmatprep.subr.bf16.mxu1 %v1820_v35  ;;  %v1844_v52 = vld [vmem:[#allocation5 + $0x124] ss:$24 sps:$4 sm:$0xff]   ;;  %v1848_v54 = vld [vmem:[#allocation5 + $0x120] ss:$24 sps:$4 sm:$0xff]   ;;  %v1850_v56 = vld [vmem:[#allocation5 + $0x154] ss:$24 sps:$4 sm:$0xff]  }
  0x33   :  { %1342 = vmatprep.subr.bf16.mxu0 %v1822_v37  ;;  %v1846_v53 = vld [vmem:[#allocation5 + $0x424] ss:$24 sps:$4 sm:$0xff]   ;;  %v1849_v55 = vld [vmem:[#allocation5 + $0x420] ss:$24 sps:$4 sm:$0xff]   ;;  %v1852_v57 = vld [vmem:[#allocation5 + $0x454] ss:$24 sps:$4 sm:$0xff]  }
  0x34   :  { %79 = vadd.xlane.f32.xlu1 %v78_v36  ;;  %v1854_v58 = vld [vmem:[#allocation5 + $0x150] ss:$24 sps:$4 sm:$0xff]   ;;  %v1856_v60 = vld [vmem:[#allocation5 + $0x184] ss:$24 sps:$4 sm:$0xff]   ;;  %v1860_v62 = vld [vmem:[#allocation5 + $0x180] ss:$24 sps:$4 sm:$0xff]  }
  0x35   :  { %1300 = vmatpush1.bf16.msra.mxu1 %v1824_v38  ;;  %1343 = vmatpush1.bf16.msra.mxu0 %v1825_v39  ;;  %v1855_v59 = vld [vmem:[#allocation5 + $0x450] ss:$24 sps:$4 sm:$0xff]   ;;  %v1858_v61 = vld [vmem:[#allocation5 + $0x484] ss:$24 sps:$4 sm:$0xff]   ;;  %v1861_v63 = vld [vmem:[#allocation5 + $0x480] ss:$24 sps:$4 sm:$0xff]  }
  0x36   :  { %1301 = vmatprep.subr.bf16.mxu1 %v1826_v40  ;;  %1344 = vmatprep.subr.bf16.mxu0 %v1828_v41  ;;  %v1862_v4 = vld [vmem:[#allocation5 + $0x1b4] ss:$24 sps:$4 sm:$0xff]   ;;  %v1866_v6 = vld [vmem:[#allocation5 + $0x1b0] ss:$24 sps:$4 sm:$0xff]   ;;  %v1868_v12 = vld [vmem:[#allocation5 + $0x1e4] ss:$24 sps:$4 sm:$0xff]  }
  0x37   :  { %v1864_v5 = vld [vmem:[#allocation5 + $0x4b4] ss:$24 sps:$4 sm:$0xff]   ;;  %v1867_v7 = vld [vmem:[#allocation5 + $0x4b0] ss:$24 sps:$4 sm:$0xff]   ;;  %v1870_v13 = vld [vmem:[#allocation5 + $0x4e4] ss:$24 sps:$4 sm:$0xff]  }
  0x38   :  { %v1872_v14 = vld [vmem:[#allocation5 + $0x1e0] ss:$24 sps:$4 sm:$0xff]   ;;  %v1874_v16 = vld [vmem:[#allocation5 + $0x214] ss:$24 sps:$4 sm:$0xff]   ;;  %v1878_v18 = vld [vmem:[#allocation5 + $0x210] ss:$24 sps:$4 sm:$0xff]  }
  0x39   :  { %1302 = vmatpush1.bf16.msra.mxu1 %v1830_v42  ;;  %1345 = vmatpush1.bf16.msra.mxu0 %v1831_v43  ;;  %v1873_v15 = vld [vmem:[#allocation5 + $0x4e0] ss:$24 sps:$4 sm:$0xff]   ;;  %v1876_v17 = vld [vmem:[#allocation5 + $0x514] ss:$24 sps:$4 sm:$0xff]   ;;  %v1879_v19 = vld [vmem:[#allocation5 + $0x510] ss:$24 sps:$4 sm:$0xff]  }
  0x3a   :  { %1303 = vmatprep.subr.bf16.mxu1 %v1832_v44  ;;  %1346 = vmatprep.subr.bf16.mxu0 %v1834_v45  ;;  %v1880_v20 = vld [vmem:[#allocation5 + $0x244] ss:$24 sps:$4 sm:$0xff]   ;;  %v1884_v22 = vld [vmem:[#allocation5 + $0x240] ss:$24 sps:$4 sm:$0xff]   ;;  %v1886_v24 = vld [vmem:[#allocation5 + $0x274] ss:$24 sps:$4 sm:$0xff]  }
  0x3b   :  { %v1882_v21 = vld [vmem:[#allocation5 + $0x544] ss:$24 sps:$4 sm:$0xff]   ;;  %v1885_v23 = vld [vmem:[#allocation5 + $0x540] ss:$24 sps:$4 sm:$0xff]   ;;  %v1888_v25 = vld [vmem:[#allocation5 + $0x574] ss:$24 sps:$4 sm:$0xff]  }
  0x3c   :  { %v1890_v26 = vld [vmem:[#allocation5 + $0x270] ss:$24 sps:$4 sm:$0xff]   ;;  %v1892_v28 = vld [vmem:[#allocation5 + $0x2a4] ss:$24 sps:$4 sm:$0xff]   ;;  %v1896_v30 = vld [vmem:[#allocation5 + $0x2a0] ss:$24 sps:$4 sm:$0xff]  }
  0x3d   :  { %1304 = vmatpush1.bf16.msra.mxu1 %v1836_v46  ;;  %1347 = vmatpush1.bf16.msra.mxu0 %v1837_v47  ;;  %v1891_v27 = vld [vmem:[#allocation5 + $0x570] ss:$24 sps:$4 sm:$0xff]   ;;  %v1894_v29 = vld [vmem:[#allocation5 + $0x5a4] ss:$24 sps:$4 sm:$0xff]   ;;  %v1897_v31 = vld [vmem:[#allocation5 + $0x5a0] ss:$24 sps:$4 sm:$0xff]  }
  0x3e   :  { %1305 = vmatprep.subr.bf16.mxu1 %v1838_v48  ;;  %1348 = vmatprep.subr.bf16.mxu0 %v1840_v49  ;;  %v1898_v32 = vld [vmem:[#allocation5 + $0x2d4] ss:$24 sps:$4 sm:$0xff]   ;;  %v1902_v34 = vld [vmem:[#allocation5 + $0x2d0] ss:$24 sps:$4 sm:$0xff]  }
  0x3f   :  { %v1900_v33 = vld [vmem:[#allocation5 + $0x5d4] ss:$24 sps:$4 sm:$0xff]   ;;  %v1903_v35 = vld [vmem:[#allocation5 + $0x5d0] ss:$24 sps:$4 sm:$0xff]  }
  0x40   :  { %v1906_v36 = vld [vmem:[#allocation5 + $0xc] ss:$24 sps:$4 sm:$0xff]  }
  0x41   :  { %1306 = vmatpush1.bf16.msra.mxu1 %v1842_v50  ;;  %1349 = vmatpush1.bf16.msra.mxu0 %v1843_v51  ;;  %v1909_v37 = vld [vmem:[#allocation5 + $0x14] ss:$24 sps:$4 sm:$0xff]  }
  0x42   :  { %1307 = vmatprep.subr.bf16.mxu1 %v1844_v52  ;;  %1350 = vmatprep.subr.bf16.mxu0 %v1846_v53 }
  0x45   :  { %1308 = vmatpush1.bf16.msra.mxu1 %v1848_v54  ;;  %1351 = vmatpush1.bf16.msra.mxu0 %v1849_v55 }
  0x46   :  { %1309 = vmatprep.subr.bf16.mxu1 %v1850_v56  ;;  %1352 = vmatprep.subr.bf16.mxu0 %v1852_v57 }
  0x49   :  { %1310 = vmatpush1.bf16.msra.mxu1 %v1854_v58  ;;  %1353 = vmatpush1.bf16.msra.mxu0 %v1855_v59 }
  0x4a   :  { %1311 = vmatprep.subr.bf16.mxu1 %v1856_v60  ;;  %1354 = vmatprep.subr.bf16.mxu0 %v1858_v61 }
  0x4d   :  { %1312 = vmatpush1.bf16.msra.mxu1 %v1860_v62  ;;  %1355 = vmatpush1.bf16.msra.mxu0 %v1861_v63 }
  0x4e   :  { %1313 = vmatprep.subr.bf16.mxu1 %v1862_v4  ;;  %1356 = vmatprep.subr.bf16.mxu0 %v1864_v5 }
  0x51   :  { %1314 = vmatpush1.bf16.msra.mxu1 %v1866_v6  ;;  %1357 = vmatpush1.bf16.msra.mxu0 %v1867_v7 }
  0x52   :  { %1315 = vmatprep.subr.bf16.mxu1 %v1868_v12  ;;  %1358 = vmatprep.subr.bf16.mxu0 %v1870_v13 }
  0x55   :  { %1316 = vmatpush1.bf16.msra.mxu1 %v1872_v14  ;;  %1359 = vmatpush1.bf16.msra.mxu0 %v1873_v15  ;;  %v1910_v14 = vld [vmem:[#allocation5 + $0x38] ss:$24 sps:$4 sm:$0xff]  }
  0x56   :  { %1317 = vmatprep.subr.bf16.mxu1 %v1874_v16  ;;  %1360 = vmatprep.subr.bf16.mxu0 %v1876_v17  ;;  %v1913_v15 = vld [vmem:[#allocation5 + $0x40] ss:$24 sps:$4 sm:$0xff]   ;;  %v1918_v16 = vld [vmem:[#allocation5 + $0x6c] ss:$24 sps:$4 sm:$0xff]  }
  0x57   :  { %v1921_v17 = vld [vmem:[#allocation5 + $0x74] ss:$24 sps:$4 sm:$0xff]  }
  0x59   :  { %1318 = vmatpush1.bf16.msra.mxu1 %v1878_v18  ;;  %1361 = vmatpush1.bf16.msra.mxu0 %v1879_v19  ;;  %v1916_v18 = vld [vmem:[#allocation5 + $0x68] ss:$24 sps:$4 sm:$0xff]  }
  0x5a   :  { %1319 = vmatprep.subr.bf16.mxu1 %v1880_v20  ;;  %1362 = vmatprep.subr.bf16.mxu0 %v1882_v21  ;;  %v1919_v19 = vld [vmem:[#allocation5 + $0x70] ss:$24 sps:$4 sm:$0xff]   ;;  %v1924_v20 = vld [vmem:[#allocation5 + $0x9c] ss:$24 sps:$4 sm:$0xff]  }
  0x5b   :  { %v1927_v21 = vld [vmem:[#allocation5 + $0xa4] ss:$24 sps:$4 sm:$0xff]  }
  0x5d   :  { %1320 = vmatpush1.bf16.msra.mxu1 %v1884_v22  ;;  %1363 = vmatpush1.bf16.msra.mxu0 %v1885_v23  ;;  %v1922_v22 = vld [vmem:[#allocation5 + $0x98] ss:$24 sps:$4 sm:$0xff]  }
  0x5e   :  { %1321 = vmatprep.subr.bf16.mxu1 %v1886_v24  ;;  %1364 = vmatprep.subr.bf16.mxu0 %v1888_v25  ;;  %v1925_v23 = vld [vmem:[#allocation5 + $0xa0] ss:$24 sps:$4 sm:$0xff]   ;;  %v1930_v24 = vld [vmem:[#allocation5 + $0xcc] ss:$24 sps:$4 sm:$0xff]  }
  0x5f   :  { %v1933_v25 = vld [vmem:[#allocation5 + $0xd4] ss:$24 sps:$4 sm:$0xff]  }
  0x61   :  { %1322 = vmatpush1.bf16.msra.mxu1 %v1890_v26  ;;  %1365 = vmatpush1.bf16.msra.mxu0 %v1891_v27  ;;  %v1928_v26 = vld [vmem:[#allocation5 + $0xc8] ss:$24 sps:$4 sm:$0xff]  }
  0x62   :  { %1323 = vmatprep.subr.bf16.mxu1 %v1892_v28  ;;  %1366 = vmatprep.subr.bf16.mxu0 %v1894_v29  ;;  %v1931_v27 = vld [vmem:[#allocation5 + $0xd0] ss:$24 sps:$4 sm:$0xff]   ;;  %v1936_v28 = vld [vmem:[#allocation5 + $0xfc] ss:$24 sps:$4 sm:$0xff]  }
  0x63   :  { %v1939_v29 = vld [vmem:[#allocation5 + $0x104] ss:$24 sps:$4 sm:$0xff]  }
  0x65   :  { %1324 = vmatpush1.bf16.msra.mxu1 %v1896_v30  ;;  %1367 = vmatpush1.bf16.msra.mxu0 %v1897_v31  ;;  %v1934_v30 = vld [vmem:[#allocation5 + $0xf8] ss:$24 sps:$4 sm:$0xff]  }
  0x66   :  { %1325 = vmatprep.subr.bf16.mxu1 %v1898_v32  ;;  %1368 = vmatprep.subr.bf16.mxu0 %v1900_v33  ;;  %v1937_v31 = vld [vmem:[#allocation5 + $0x100] ss:$24 sps:$4 sm:$0xff]   ;;  %v1942_v32 = vld [vmem:[#allocation5 + $0x12c] ss:$24 sps:$4 sm:$0xff]  }
  0x67   :  { %v1945_v33 = vld [vmem:[#allocation5 + $0x134] ss:$24 sps:$4 sm:$0xff]  }
  0x69   :  { %1326 = vmatpush1.bf16.msra.mxu1 %v1902_v34  ;;  %1369 = vmatpush1.bf16.msra.mxu0 %v1903_v35  ;;  %v1940_v34 = vld [vmem:[#allocation5 + $0x128] ss:$24 sps:$4 sm:$0xff]  }
  0x6a   :  { %1381 = vmatprep.subr.bf16.mxu1 %v1906_v36  ;;  %1467 = vmatprep.subr.bf16.mxu0 %v1909_v37  ;;  %v1943_v35 = vld [vmem:[#allocation5 + $0x130] ss:$24 sps:$4 sm:$0xff]   ;;  %v1948_v36 = vld [vmem:[#allocation5 + $0x15c] ss:$24 sps:$4 sm:$0xff]  }
  0x6b   :  { %v1951_v37 = vld [vmem:[#allocation5 + $0x164] ss:$24 sps:$4 sm:$0xff]  }
  0xbb   :  { %v55_v38 = vpop.xlane.xlu0 %54 }
  0xbc   :  { %v61_v39 = vmul.f32 0.001953125, %v55_v38  ;;  %v1946_v38 = vld [vmem:[#allocation5 + $0x158] ss:$24 sps:$4 sm:$0xff]  }
  0xbd   :  { %v75_v40 = vpop.xlane.xlu1 %74 }
  0xbe   :  { %v81_v41 = vmul.f32 0.001953125, %v75_v40  ;;  %v83_v42 = vmul.f32 %v61_v39, %v61_v39  ;;  %v88_v53 = vsub.f32 %v2227_v1, %v61_v39  ;;  %v90_v54 = vsub.f32 %v2231_v3, %v61_v39  ;;  %v1954_v40 = vld [vmem:[#allocation5 + $0x18c] ss:$24 sps:$4 sm:$0xff]  }
  0xbf   :  { %v60_v43 = vpop.xlane.xlu0 %59  ;;  %v87_v55 = vsub.f32 %v2225_v0, %v61_v39  ;;  %v89_v56 = vsub.f32 %v2229_v2, %v61_v39  ;;  %v1904_v2 = vld [vmem:[#allocation5 + $0x8] ss:$24 sps:$4 sm:$0xff]  }
  0xc0   :  { %v85_v44 = vsub.f32 %v81_v41, %v83_v42  ;;  %v62_v45 = vmul.f32 0.001953125, %v60_v43  ;;  %v1949_v39 = vld [vmem:[#allocation5 + $0x160] ss:$24 sps:$4 sm:$0xff]   ;;  %v1957_v41 = vld [vmem:[#allocation5 + $0x194] ss:$24 sps:$4 sm:$0xff]  }
  0xc1   :  { %v80_v46 = vpop.xlane.xlu1 %79  ;;  %v1952_v42 = vld [vmem:[#allocation5 + $0x188] ss:$24 sps:$4 sm:$0xff]  }
  0xc2   :  { %v95_v47 = vadd.f32 1e-05, %v85_v44  ;;  %v82_v48 = vmul.f32 0.001953125, %v80_v46  ;;  %v84_v49 = vmul.f32 %v62_v45, %v62_v45  ;;  %v92_v57 = vsub.f32 %v2243_v9, %v62_v45  ;;  %v1907_v9 = vld [vmem:[#allocation5 + $0x10] ss:$24 sps:$4 sm:$0xff]  }
  0xc3   :  { %v94_v58 = vsub.f32 %v2247_v11, %v62_v45  ;;  %v91_v59 = vsub.f32 %v2241_v8, %v62_v45  ;;  %v93_v60 = vsub.f32 %v2245_v10, %v62_v45  ;;  %v1912_v8 = vld [vmem:[#allocation5 + $0x3c] ss:$24 sps:$4 sm:$0xff]   ;;  %v1955_v43 = vld [vmem:[#allocation5 + $0x190] ss:$24 sps:$4 sm:$0xff]  }
  0xc4   :  { %v86_v50 = vsub.f32 %v82_v48, %v84_v49  ;;  %2096 = vrsqrt.f32 %v95_v47  ;;  %v1915_v10 = vld [vmem:[#allocation5 + $0x44] ss:$24 sps:$4 sm:$0xff]   ;;  %v1958_v46 = vld [vmem:[#allocation5 + $0x1b8] ss:$24 sps:$4 sm:$0xff]   ;;  %v1969_v49 = vld [vmem:[#allocation5 + $0x1f4] ss:$24 sps:$4 sm:$0xff]  }
  0xc5   :  { %v1960_v44 = vld [vmem:[#allocation5 + $0x1bc] ss:$24 sps:$4 sm:$0xff]   ;;  %v1961_v47 = vld [vmem:[#allocation5 + $0x1c0] ss:$24 sps:$4 sm:$0xff]   ;;  %v1966_v48 = vld [vmem:[#allocation5 + $0x1ec] ss:$24 sps:$4 sm:$0xff]  }
  0xc6   :  { %v96_v51 = vadd.f32 1e-05, %v86_v50  ;;  %v1963_v45 = vld [vmem:[#allocation5 + $0x1c4] ss:$24 sps:$4 sm:$0xff]   ;;  %v1964_v50 = vld [vmem:[#allocation5 + $0x1e8] ss:$24 sps:$4 sm:$0xff]  }
  0xc8   :  { %2098 = vrsqrt.f32 %v96_v51  ;;  %v1967_v51 = vld [vmem:[#allocation5 + $0x1f0] ss:$24 sps:$4 sm:$0xff]  }
  0xce   :  { %v2097_v52 = vpop.eup %2096 }
  0xcf   :  { %v100_v62 = vmul.f32 %v2097_v52, %v88_v53  ;;  %v102_v63 = vmul.f32 %v2097_v52, %v90_v54  ;;  %v99_v4 = vmul.f32 %v2097_v52, %v87_v55  ;;  %v101_v5 = vmul.f32 %v2097_v52, %v89_v56  ;;  %v1972_v52 = vld [vmem:[#allocation5 + $0x21c] ss:$24 sps:$4 sm:$0xff]   ;;  %v1970_v54 = vld [vmem:[#allocation5 + $0x218] ss:$24 sps:$4 sm:$0xff]   ;;  %v1978_v56 = vld [vmem:[#allocation5 + $0x24c] ss:$24 sps:$4 sm:$0xff]  }
  0xd0   :  { %v1975_v53 = vld [vmem:[#allocation5 + $0x224] ss:$24 sps:$4 sm:$0xff]   ;;  %v1973_v55 = vld [vmem:[#allocation5 + $0x220] ss:$24 sps:$4 sm:$0xff]  }
  0xd2   :  { %v2099_v61 = vpop.eup %2098 }
  0xd3   :  { %v104_v1 = vmul.f32 %v2099_v61, %v92_v57  ;;  %v106_v6 = vmul.f32 %v2099_v61, %v94_v58  ;;  %v103_v3 = vmul.f32 %v2099_v61, %v91_v59  ;;  %v105_v7 = vmul.f32 %v2099_v61, %v93_v60  ;;  %v1981_v57 = vld [vmem:[#allocation5 + $0x254] ss:$24 sps:$4 sm:$0xff]   ;;  %v1976_v58 = vld [vmem:[#allocation5 + $0x248] ss:$24 sps:$4 sm:$0xff]   ;;  %v1987_v61 = vld [vmem:[#allocation5 + $0x284] ss:$24 sps:$4 sm:$0xff]  }
  0xd4   :  { %v1979_v59 = vld [vmem:[#allocation5 + $0x250] ss:$24 sps:$4 sm:$0xff]   ;;  %v1984_v60 = vld [vmem:[#allocation5 + $0x27c] ss:$24 sps:$4 sm:$0xff]  }
  0xd5   :  { %v108_v0 = vpack.c.bf16 %v104_v1, %v100_v62  ;;  %v2273_v12 = vpack.c.bf16 %v106_v6, %v102_v63  ;;  %v2275_v13 = vpack.c.bf16 %v103_v3, %v99_v4  ;;  %v2277_v11 = vpack.c.bf16 %v105_v7, %v101_v5  ;;  %v1982_v62 = vld [vmem:[#allocation5 + $0x278] ss:$24 sps:$4 sm:$0xff]   ;;  %v1990_v4 = vld [vmem:[#allocation5 + $0x2ac] ss:$24 sps:$4 sm:$0xff]   ;;  %v1988_v1 = vld [vmem:[#allocation5 + $0x2a8] ss:$24 sps:$4 sm:$0xff]  }
  0xd6   :  { %v1985_v63 = vld [vmem:[#allocation5 + $0x280] ss:$24 sps:$4 sm:$0xff]   ;;  %v1993_v5 = vld [vmem:[#allocation5 + $0x2b4] ss:$24 sps:$4 sm:$0xff]   ;;  %v1991_v6 = vld [vmem:[#allocation5 + $0x2b0] ss:$24 sps:$4 sm:$0xff]  }
  0xd7   :  { %1327 = vmatprep.mubr.bf16.mxu1 %v108_v0  ;;  %1370 = vmatprep.mubr.bf16.mxu0 %v2273_v12  ;;  %v1996_v3 = vld [vmem:[#allocation5 + $0x2dc] ss:$24 sps:$4 sm:$0xff]  }
  0xd8   :  { %1328 = vmatmul.mubr.bf16.vlgmr.msra.gmra.mrb[0].mxu1 %v2275_v13  ;;  %1371 = vmatmul.mubr.bf16.vlgmr.msra.gmra.mrb[0].mxu0 %v2277_v11  ;;  %v1999_v7 = vld [vmem:[#allocation5 + $0x2e4] ss:$24 sps:$4 sm:$0xff]  }
  0xd9   :  { %1382 = vmatpush1.bf16.msra.mxu1 %v1904_v2  ;;  %1468 = vmatpush1.bf16.msra.mxu0 %v1907_v9  ;;  %v1997_v2 = vld [vmem:[#allocation5 + $0x2e0] ss:$24 sps:$4 sm:$0xff]   ;;  %v2002_v9 = vld [vmem:[#allocation5 + $0x30c] ss:$24 sps:$4 sm:$0xff]  }
  0xda   :  { %1413 = vmatprep.mubr.bf16.mxu1 %v108_v0  ;;  %1499 = vmatprep.mubr.bf16.mxu0 %v108_v0  ;;  %v1994_v0 = vld [vmem:[#allocation5 + $0x2d8] ss:$24 sps:$4 sm:$0xff]  }
  0xdb   :  { %1383 = vmatprep.subr.bf16.mxu1 %v1912_v8  ;;  %1469 = vmatprep.subr.bf16.mxu0 %v1915_v10  ;;  %v2005_v8 = vld [vmem:[#allocation5 + $0x314] ss:$24 sps:$4 sm:$0xff]   ;;  %v2000_v10 = vld [vmem:[#allocation5 + $0x308] ss:$24 sps:$4 sm:$0xff]  }
  0xdd   :  { %1384 = vmatpush1.bf16.msra.mxu1 %v1910_v14  ;;  %1470 = vmatpush1.bf16.msra.mxu0 %v1913_v15  ;;  %v2003_v14 = vld [vmem:[#allocation5 + $0x310] ss:$24 sps:$4 sm:$0xff]   ;;  %v2008_v15 = vld [vmem:[#allocation5 + $0x33c] ss:$24 sps:$4 sm:$0xff]  }
  0xde   :  { %1385 = vmatprep.subr.bf16.mxu1 %v1918_v16  ;;  %1471 = vmatprep.subr.bf16.mxu0 %v1921_v17  ;;  %v2011_v16 = vld [vmem:[#allocation5 + $0x344] ss:$24 sps:$4 sm:$0xff]   ;;  %v2006_v17 = vld [vmem:[#allocation5 + $0x338] ss:$24 sps:$4 sm:$0xff]  }
  0xe1   :  { %1386 = vmatpush1.bf16.msra.mxu1 %v1916_v18  ;;  %1472 = vmatpush1.bf16.msra.mxu0 %v1919_v19  ;;  %v2009_v18 = vld [vmem:[#allocation5 + $0x340] ss:$24 sps:$4 sm:$0xff]   ;;  %v2014_v19 = vld [vmem:[#allocation5 + $0x36c] ss:$24 sps:$4 sm:$0xff]  }
  0xe2   :  { %1387 = vmatprep.subr.bf16.mxu1 %v1924_v20  ;;  %1473 = vmatprep.subr.bf16.mxu0 %v1927_v21  ;;  %v2017_v20 = vld [vmem:[#allocation5 + $0x374] ss:$24 sps:$4 sm:$0xff]   ;;  %v2012_v21 = vld [vmem:[#allocation5 + $0x368] ss:$24 sps:$4 sm:$0xff]  }
  0xe5   :  { %1388 = vmatpush1.bf16.msra.mxu1 %v1922_v22  ;;  %1474 = vmatpush1.bf16.msra.mxu0 %v1925_v23  ;;  %v2015_v22 = vld [vmem:[#allocation5 + $0x370] ss:$24 sps:$4 sm:$0xff]   ;;  %v2020_v23 = vld [vmem:[#allocation5 + $0x39c] ss:$24 sps:$4 sm:$0xff]  }
  0xe6   :  { %1389 = vmatprep.subr.bf16.mxu1 %v1930_v24  ;;  %1475 = vmatprep.subr.bf16.mxu0 %v1933_v25  ;;  %v2018_v24 = vld [vmem:[#allocation5 + $0x398] ss:$24 sps:$4 sm:$0xff]  }
  0xe7   :  { %v2021_v25 = vld [vmem:[#allocation5 + $0x3a0] ss:$24 sps:$4 sm:$0xff]  }
  0xe9   :  { %1390 = vmatpush1.bf16.msra.mxu1 %v1928_v26  ;;  %1476 = vmatpush1.bf16.msra.mxu0 %v1931_v27  ;;  %v2026_v26 = vld [vmem:[#allocation5 + $0x3cc] ss:$24 sps:$4 sm:$0xff]   ;;  %v2024_v27 = vld [vmem:[#allocation5 + $0x3c8] ss:$24 sps:$4 sm:$0xff]  }
  0xea   :  { %1391 = vmatprep.subr.bf16.mxu1 %v1936_v28  ;;  %1477 = vmatprep.subr.bf16.mxu0 %v1939_v29  ;;  %v2027_v28 = vld [vmem:[#allocation5 + $0x3d0] ss:$24 sps:$4 sm:$0xff]   ;;  %v2032_v29 = vld [vmem:[#allocation5 + $0x3fc] ss:$24 sps:$4 sm:$0xff]  }
  0xed   :  { %1392 = vmatpush1.bf16.msra.mxu1 %v1934_v30  ;;  %1478 = vmatpush1.bf16.msra.mxu0 %v1937_v31  ;;  %v2035_v30 = vld [vmem:[#allocation5 + $0x404] ss:$24 sps:$4 sm:$0xff]   ;;  %v2030_v31 = vld [vmem:[#allocation5 + $0x3f8] ss:$24 sps:$4 sm:$0xff]  }
  0xee   :  { %1393 = vmatprep.subr.bf16.mxu1 %v1942_v32  ;;  %1479 = vmatprep.subr.bf16.mxu0 %v1945_v33  ;;  %v2033_v32 = vld [vmem:[#allocation5 + $0x400] ss:$24 sps:$4 sm:$0xff]   ;;  %v2038_v33 = vld [vmem:[#allocation5 + $0x42c] ss:$24 sps:$4 sm:$0xff]  }
  0xf1   :  { %1394 = vmatpush1.bf16.msra.mxu1 %v1940_v34  ;;  %1480 = vmatpush1.bf16.msra.mxu0 %v1943_v35  ;;  %v2041_v34 = vld [vmem:[#allocation5 + $0x434] ss:$24 sps:$4 sm:$0xff]   ;;  %v2036_v35 = vld [vmem:[#allocation5 + $0x428] ss:$24 sps:$4 sm:$0xff]  }
  0xf2   :  { %1395 = vmatprep.subr.bf16.mxu1 %v1948_v36  ;;  %1481 = vmatprep.subr.bf16.mxu0 %v1951_v37  ;;  %v2039_v36 = vld [vmem:[#allocation5 + $0x430] ss:$24 sps:$4 sm:$0xff]   ;;  %v2044_v37 = vld [vmem:[#allocation5 + $0x45c] ss:$24 sps:$4 sm:$0xff]  }
  0xf5   :  { %1396 = vmatpush1.bf16.msra.mxu1 %v1946_v38  ;;  %1482 = vmatpush1.bf16.msra.mxu0 %v1949_v39  ;;  %v2047_v38 = vld [vmem:[#allocation5 + $0x464] ss:$24 sps:$4 sm:$0xff]   ;;  %v2042_v39 = vld [vmem:[#allocation5 + $0x458] ss:$24 sps:$4 sm:$0xff]  }
  0xf6   :  { %1397 = vmatprep.subr.bf16.mxu1 %v1954_v40  ;;  %1483 = vmatprep.subr.bf16.mxu0 %v1957_v41  ;;  %v2045_v40 = vld [vmem:[#allocation5 + $0x460] ss:$24 sps:$4 sm:$0xff]   ;;  %v2050_v41 = vld [vmem:[#allocation5 + $0x48c] ss:$24 sps:$4 sm:$0xff]  }
  0xf9   :  { %1398 = vmatpush1.bf16.msra.mxu1 %v1952_v42  ;;  %1484 = vmatpush1.bf16.msra.mxu0 %v1955_v43  ;;  %v2053_v42 = vld [vmem:[#allocation5 + $0x494] ss:$24 sps:$4 sm:$0xff]   ;;  %v2048_v43 = vld [vmem:[#allocation5 + $0x488] ss:$24 sps:$4 sm:$0xff]  }
  0xfa   :  { %1399 = vmatprep.subr.bf16.mxu1 %v1960_v44  ;;  %1485 = vmatprep.subr.bf16.mxu0 %v1963_v45  ;;  %v2051_v44 = vld [vmem:[#allocation5 + $0x490] ss:$24 sps:$4 sm:$0xff]   ;;  %v2056_v45 = vld [vmem:[#allocation5 + $0x4bc] ss:$24 sps:$4 sm:$0xff]  }
  0xfd   :  { %1400 = vmatpush1.bf16.msra.mxu1 %v1958_v46  ;;  %1486 = vmatpush1.bf16.msra.mxu0 %v1961_v47  ;;  %v2059_v46 = vld [vmem:[#allocation5 + $0x4c4] ss:$24 sps:$4 sm:$0xff]   ;;  %v2054_v47 = vld [vmem:[#allocation5 + $0x4b8] ss:$24 sps:$4 sm:$0xff]  }
  0xfe   :  { %1401 = vmatprep.subr.bf16.mxu1 %v1966_v48  ;;  %1487 = vmatprep.subr.bf16.mxu0 %v1969_v49  ;;  %v2057_v48 = vld [vmem:[#allocation5 + $0x4c0] ss:$24 sps:$4 sm:$0xff]   ;;  %v2062_v49 = vld [vmem:[#allocation5 + $0x4ec] ss:$24 sps:$4 sm:$0xff]  }
 0x101   :  { %1402 = vmatpush1.bf16.msra.mxu1 %v1964_v50  ;;  %1488 = vmatpush1.bf16.msra.mxu0 %v1967_v51  ;;  %v2065_v50 = vld [vmem:[#allocation5 + $0x4f4] ss:$24 sps:$4 sm:$0xff]   ;;  %v2060_v51 = vld [vmem:[#allocation5 + $0x4e8] ss:$24 sps:$4 sm:$0xff]  }
 0x102   :  { %1403 = vmatprep.subr.bf16.mxu1 %v1972_v52  ;;  %1489 = vmatprep.subr.bf16.mxu0 %v1975_v53  ;;  %v2063_v52 = vld [vmem:[#allocation5 + $0x4f0] ss:$24 sps:$4 sm:$0xff]   ;;  %v2068_v53 = vld [vmem:[#allocation5 + $0x51c] ss:$24 sps:$4 sm:$0xff]  }
 0x105   :  { %1404 = vmatpush1.bf16.msra.mxu1 %v1970_v54  ;;  %1490 = vmatpush1.bf16.msra.mxu0 %v1973_v55  ;;  %v2071_v54 = vld [vmem:[#allocation5 + $0x524] ss:$24 sps:$4 sm:$0xff]   ;;  %v2066_v55 = vld [vmem:[#allocation5 + $0x518] ss:$24 sps:$4 sm:$0xff]  }
 0x106   :  { %1405 = vmatprep.subr.bf16.mxu1 %v1978_v56  ;;  %1491 = vmatprep.subr.bf16.mxu0 %v1981_v57  ;;  %v2069_v56 = vld [vmem:[#allocation5 + $0x520] ss:$24 sps:$4 sm:$0xff]   ;;  %v2074_v57 = vld [vmem:[#allocation5 + $0x54c] ss:$24 sps:$4 sm:$0xff]  }
 0x109   :  { %1406 = vmatpush1.bf16.msra.mxu1 %v1976_v58  ;;  %1492 = vmatpush1.bf16.msra.mxu0 %v1979_v59  ;;  %v2077_v58 = vld [vmem:[#allocation5 + $0x554] ss:$24 sps:$4 sm:$0xff]   ;;  %v2072_v59 = vld [vmem:[#allocation5 + $0x548] ss:$24 sps:$4 sm:$0xff]  }
 0x10a   :  { %1407 = vmatprep.subr.bf16.mxu1 %v1984_v60  ;;  %1493 = vmatprep.subr.bf16.mxu0 %v1987_v61  ;;  %v2075_v60 = vld [vmem:[#allocation5 + $0x550] ss:$24 sps:$4 sm:$0xff]   ;;  %v2080_v61 = vld [vmem:[#allocation5 + $0x57c] ss:$24 sps:$4 sm:$0xff]  }
 0x10d   :  { %1408 = vmatpush1.bf16.msra.mxu1 %v1982_v62  ;;  %1494 = vmatpush1.bf16.msra.mxu0 %v1985_v63  ;;  %v2083_v62 = vld [vmem:[#allocation5 + $0x584] ss:$24 sps:$4 sm:$0xff]   ;;  %v2078_v63 = vld [vmem:[#allocation5 + $0x578] ss:$24 sps:$4 sm:$0xff]  }
 0x10e   :  { %1409 = vmatprep.subr.bf16.mxu1 %v1990_v4  ;;  %1495 = vmatprep.subr.bf16.mxu0 %v1993_v5  ;;  %v2081_v4 = vld [vmem:[#allocation5 + $0x580] ss:$24 sps:$4 sm:$0xff]   ;;  %v2086_v5 = vld [vmem:[#allocation5 + $0x5ac] ss:$24 sps:$4 sm:$0xff]  }
 0x111   :  { %1410 = vmatpush1.bf16.msra.mxu1 %v1988_v1  ;;  %1496 = vmatpush1.bf16.msra.mxu0 %v1991_v6  ;;  %v2089_v1 = vld [vmem:[#allocation5 + $0x5b4] ss:$24 sps:$4 sm:$0xff]   ;;  %v2084_v6 = vld [vmem:[#allocation5 + $0x5a8] ss:$24 sps:$4 sm:$0xff]  }
 0x112   :  { %1411 = vmatprep.subr.bf16.mxu1 %v1996_v3  ;;  %1497 = vmatprep.subr.bf16.mxu0 %v1999_v7  ;;  %v2087_v3 = vld [vmem:[#allocation5 + $0x5b0] ss:$24 sps:$4 sm:$0xff]   ;;  %v2092_v7 = vld [vmem:[#allocation5 + $0x5dc] ss:$24 sps:$4 sm:$0xff]  }
 0x115   :  { %1412 = vmatpush1.bf16.msra.mxu1 %v1994_v0  ;;  %1498 = vmatpush1.bf16.msra.mxu0 %v1997_v2  ;;  %v2095_v0 = vld [vmem:[#allocation5 + $0x5e4] ss:$24 sps:$4 sm:$0xff]   ;;  %v2090_v2 = vld [vmem:[#allocation5 + $0x5d8] ss:$24 sps:$4 sm:$0xff]  }
 0x116   :  { %1424 = vmatprep.subr.bf16.mxu1 %v2002_v9  ;;  %1510 = vmatprep.subr.bf16.mxu0 %v2005_v8  ;;  %v2093_v9 = vld [vmem:[#allocation5 + $0x5e0] ss:$24 sps:$4 sm:$0xff]   ;;  %v305_v8 = vlaneseq }
 0x118   :  { %1414 = vmatmul.mubr.bf16.vlgmr.msra.gmra.mrb[4].mxu1 %v2275_v13  ;;  %1500 = vmatmul.mubr.bf16.vlgmr.msra.gmra.mrb[4].mxu0 %v2275_v13  ;;  %v2023_v13 = vld [vmem:[#allocation5 + $0x3a4] ss:$24 sps:$4 sm:$0xff]  }
 0x119   :  { %1425 = vmatpush1.bf16.msra.mxu1 %v2000_v10  ;;  %1456 = vmatprep.mubr.bf16.mxu1 %v2273_v12  ;;  %v306_v10 = vshrl.u32 %v305_v8, 7 }
 0x11a   :  { %1511 = vmatpush1.bf16.msra.mxu0 %v2003_v14  ;;  %1542 = vmatprep.mubr.bf16.mxu0 %v2273_v12  ;;  %v2029_v12 = vld [vmem:[#allocation5 + $0x3d4] ss:$24 sps:$4 sm:$0xff]  }
 0x11b   :  { %1426 = vmatprep.subr.bf16.mxu1 %v2008_v15  ;;  %1512 = vmatprep.subr.bf16.mxu0 %v2011_v16  ;;  %v307_v14 = vsub.s32 0, %v306_v10  ;;  %v303_v15 = vld [vmem:[%s2305_s2] sm:$0x3f]  ;;  %v311_v16 = vsub.s32 1, %v306_v10  ;;  %s2178_s2 = smov [#allocation7]  }
 0x11c   :  { %s1570_s13 = sshll.u32 %s2178_s2, 4  ;;  %s1571_s13 = int_to_ptr.vmem [resolvable:$true] %s1570_s13 }
 0x11d   :  { %1427 = vmatpush1.bf16.msra.mxu1 %v2006_v17  ;;  %v308_v17 = vrot.slane %v303_v15, %v307_v14  ;;  %s2144_s14 = scalar_lea.vmem %s1571_s13, 1536  ;;  %p2149_p3 = scmp.lt.s32.totalorder %s1571_s13, %s1571_s13 }
 0x11e   :  { %1513 = vmatpush1.bf16.msra.mxu0 %v2009_v18  ;;  %1428 = vmatprep.subr.bf16.mxu1 %v2014_v19  ;;  %v312_v18 = vrot.slane %v303_v15, %v311_v16  ;;  %p2145_p2 = scmp.ne.s32.totalorder %s1571_s13, %s2144_s14  ;;  %p2150_p4 = scmp.lt.s32.totalorder %s2144_s14, %s2144_s14 }
 0x11f   :  { %1514 = vmatprep.subr.bf16.mxu0 %v2017_v20 }
 0x120   :  { %p2151_p5 = por %p2150_p4, %p2149_p3 }
 0x121   :  { %1429 = vmatpush1.bf16.msra.mxu1 %v2012_v21 }
 0x122   :  { %1515 = vmatpush1.bf16.msra.mxu0 %v2015_v22  ;;  %1430 = vmatprep.subr.bf16.mxu1 %v2020_v23  ;;  %p2152_p6 = pnand %p2151_p5, %p2145_p2 }
 0x123   :  { %1516 = vmatprep.subr.bf16.mxu0 %v2023_v13 }
 0x125   :  { %1431 = vmatpush1.bf16.msra.mxu1 %v2018_v24 }
 0x126   :  { %1517 = vmatpush1.bf16.msra.mxu0 %v2021_v25  ;;  %1432 = vmatprep.subr.bf16.mxu1 %v2026_v26 }
 0x127   :  { %1518 = vmatprep.subr.bf16.mxu0 %v2029_v12 }
 0x129   :  { %1433 = vmatpush1.bf16.msra.mxu1 %v2024_v27 }
 0x12a   :  { %1519 = vmatpush1.bf16.msra.mxu0 %v2027_v28  ;;  %1434 = vmatprep.subr.bf16.mxu1 %v2032_v29 }
 0x12b   :  { %1520 = vmatprep.subr.bf16.mxu0 %v2035_v30 }
 0x12d   :  { %1435 = vmatpush1.bf16.msra.mxu1 %v2030_v31 }
 0x12e   :  { %1521 = vmatpush1.bf16.msra.mxu0 %v2033_v32  ;;  %1436 = vmatprep.subr.bf16.mxu1 %v2038_v33  ;;  %v315_v32 = vsub.s32 2, %v306_v10  ;;  %v323_v33 = vsub.s32 4, %v306_v10 }
 0x12f   :  { %1522 = vmatprep.subr.bf16.mxu0 %v2041_v34  ;;  %v319_v34 = vsub.s32 3, %v306_v10 }
 0x131   :  { %1437 = vmatpush1.bf16.msra.mxu1 %v2036_v35  ;;  %v327_v35 = vsub.s32 5, %v306_v10 }
 0x132   :  { %1523 = vmatpush1.bf16.msra.mxu0 %v2039_v36  ;;  %1438 = vmatprep.subr.bf16.mxu1 %v2044_v37  ;;  %v316_v36 = vrot.slane %v303_v15, %v315_v32  ;;  %v324_v37 = vrot.slane %v303_v15, %v323_v33 }
 0x133   :  { %1524 = vmatprep.subr.bf16.mxu0 %v2047_v38  ;;  %v320_v38 = vrot.slane %v303_v15, %v319_v34 }
 0x135   :  { %1439 = vmatpush1.bf16.msra.mxu1 %v2042_v39  ;;  %v328_v39 = vrot.slane %v303_v15, %v327_v35 }
 0x136   :  { %1525 = vmatpush1.bf16.msra.mxu0 %v2045_v40  ;;  %1440 = vmatprep.subr.bf16.mxu1 %v2050_v41 }
 0x137   :  { %1526 = vmatprep.subr.bf16.mxu0 %v2053_v42 }
 0x139   :  { %1441 = vmatpush1.bf16.msra.mxu1 %v2048_v43 }
 0x13a   :  { %1527 = vmatpush1.bf16.msra.mxu0 %v2051_v44  ;;  %1442 = vmatprep.subr.bf16.mxu1 %v2056_v45 }
 0x13b   :  { %1528 = vmatprep.subr.bf16.mxu0 %v2059_v46 }
 0x13d   :  { %1443 = vmatpush1.bf16.msra.mxu1 %v2054_v47 }
 0x13e   :  { %1529 = vmatpush1.bf16.msra.mxu0 %v2057_v48  ;;  %1444 = vmatprep.subr.bf16.mxu1 %v2062_v49 }
 0x13f   :  { %1530 = vmatprep.subr.bf16.mxu0 %v2065_v50 }
 0x141   :  { %1445 = vmatpush1.bf16.msra.mxu1 %v2060_v51 }
 0x142   :  { %1531 = vmatpush1.bf16.msra.mxu0 %v2063_v52  ;;  %1446 = vmatprep.subr.bf16.mxu1 %v2068_v53 }
 0x143   :  { %1532 = vmatprep.subr.bf16.mxu0 %v2071_v54 }
 0x145   :  { %1447 = vmatpush1.bf16.msra.mxu1 %v2066_v55 }
 0x146   :  { %1533 = vmatpush1.bf16.msra.mxu0 %v2069_v56  ;;  %1448 = vmatprep.subr.bf16.mxu1 %v2074_v57 }
 0x147   :  { %1534 = vmatprep.subr.bf16.mxu0 %v2077_v58 }
 0x149   :  { %1449 = vmatpush1.bf16.msra.mxu1 %v2072_v59 }
 0x14a   :  { %1535 = vmatpush1.bf16.msra.mxu0 %v2075_v60  ;;  %1450 = vmatprep.subr.bf16.mxu1 %v2080_v61 }
 0x14b   :  { %1536 = vmatprep.subr.bf16.mxu0 %v2083_v62 }
 0x14d   :  { %1451 = vmatpush1.bf16.msra.mxu1 %v2078_v63 }
 0x14e   :  { %1537 = vmatpush1.bf16.msra.mxu0 %v2081_v4  ;;  %1452 = vmatprep.subr.bf16.mxu1 %v2086_v5 }
 0x14f   :  { %1538 = vmatprep.subr.bf16.mxu0 %v2089_v1 }
 0x151   :  { %1453 = vmatpush1.bf16.msra.mxu1 %v2084_v6 }
 0x152   :  { %1539 = vmatpush1.bf16.msra.mxu0 %v2087_v3  ;;  %1454 = vmatprep.subr.bf16.mxu1 %v2092_v7 }
 0x153   :  { %1540 = vmatprep.subr.bf16.mxu0 %v2095_v0 }
 0x155   :  { %1455 = vmatpush1.bf16.msra.mxu1 %v2090_v2 }
 0x156   :  { %1541 = vmatpush1.bf16.msra.mxu0 %v2093_v9 }
 0x158   :  { %1457 = vmatmul.mubr.bf16.vlgmr.msra.gmra.mrb[4].mxu1 %v2277_v11 }
 0x159   :  { %1543 = vmatmul.mubr.bf16.vlgmr.msra.gmra.mrb[4].mxu0 %v2277_v11 }
 0x1ab   :  { %v1329_v19 = vpop.f32.mrb[0].mxu1  ;;  %v1372_v20 = vpop.f32.mrb[0].mxu0 }
 0x1ac   :  { %v1330_v21 = vadd.f32 %v1329_v19, %v308_v17  ;;  %v1331_v22 = vpop.f32.mrb[1].mxu1  ;;  %v1374_v23 = vpop.f32.mrb[1].mxu0 }
 0x1ad   :  { %v1332_v13 = vadd.f32 %v1331_v22, %v312_v18  ;;  %v1333_v24 = vpop.f32.mrb[2].mxu1  ;;  %v1376_v25 = vpop.f32.mrb[2].mxu0 }
 0x1ae   :  { %v1373_v26 = vadd.f32 %v1372_v20, %v1330_v21  ;;  %v1334_v11 = vadd.f32 %v1333_v24, %v308_v17  ;;  %v1335_v12 = vpop.f32.mrb[3].mxu1  ;;  %v1378_v27 = vpop.f32.mrb[3].mxu0 }
 0x1af   :  { %v1375_v28 = vadd.f32 %v1374_v23, %v1332_v13  ;;  %v1336_v29 = vadd.f32 %v1335_v12, %v312_v18 }
 0x1b0   :  { %1553 = vst [vmem:[#allocation7] sm:$0xff] %v1373_v26  ;;  %v1377_v30 = vadd.f32 %v1376_v25, %v1334_v11 }
 0x1b1   :  { %1554 = vst [vmem:[#allocation7 + $0x8] sm:$0xff] %v1375_v28  ;;  %v1379_v31 = vadd.f32 %v1378_v27, %v1336_v29 }
 0x1b2   :  { %1559 = vst [vmem:[#allocation7 + $0x30] sm:$0xff] %v1377_v30 }
 0x1b3   :  { %1560 = vst [vmem:[#allocation7 + $0x38] sm:$0xff] %v1379_v31 }
 0x22b   :  { %v1458_v40 = vpop.f32.mrb[4].mxu1 }
 0x22c   :  { %v1783_v41 = vadd.f32 %v1458_v40, %v316_v36  ;;  %v1544_v42 = vpop.f32.mrb[4].mxu0  ;;  %v1460_v43 = vpop.f32.mrb[5].mxu1 }
 0x22d   :  { %v1787_v44 = vadd.f32 %v1544_v42, %v324_v37  ;;  %v1784_v45 = vadd.f32 %v1460_v43, %v320_v38  ;;  %v1546_v46 = vpop.f32.mrb[5].mxu0  ;;  %v1462_v47 = vpop.f32.mrb[6].mxu1 }
 0x22e   :  { %1555 = vst [vmem:[#allocation7 + $0x10] sm:$0xff] %v1783_v41  ;;  %v1788_v48 = vadd.f32 %v1546_v46, %v328_v39  ;;  %v1785_v49 = vadd.f32 %v1462_v47, %v316_v36  ;;  %v1548_v50 = vpop.f32.mrb[6].mxu0  ;;  %v1464_v51 = vpop.f32.mrb[7].mxu1 }
 0x22f   :  { %1557 = vst [vmem:[#allocation7 + $0x20] sm:$0xff] %v1787_v44  ;;  %1556 = vst [vmem:[#allocation7 + $0x18] sm:$0xff] %v1784_v45  ;;  %v1789_v52 = vadd.f32 %v1548_v50, %v324_v37  ;;  %v1786_v53 = vadd.f32 %v1464_v51, %v320_v38  ;;  %v1550_v54 = vpop.f32.mrb[7].mxu0 }
 0x230   :  { %1558 = vst [vmem:[#allocation7 + $0x28] sm:$0xff] %v1788_v48  ;;  %1561 = vst [vmem:[#allocation7 + $0x40] sm:$0xff] %v1785_v49  ;;  %v1790_v55 = vadd.f32 %v1550_v54, %v328_v39 }
 0x231   :  { %1563 = vst [vmem:[#allocation7 + $0x50] sm:$0xff] %v1789_v52  ;;  %1562 = vst [vmem:[#allocation7 + $0x48] sm:$0xff] %v1786_v53 }
 0x232   :  { %1564 = vst [vmem:[#allocation7 + $0x58] sm:$0xff] %v1790_v55 }
 0x233   :  { %2155 = shalt.err (!%p2152_p6)
}
 0x234   :  { %s2156_s17 = scalar_lea.hbm %s2306_s3, 1536 }
 0x235   :  { %p2157_p7 = scmp.ne.s32.totalorder %s2306_s3, %s2156_s17  ;;  %p2160_p8 = scmp.lt.u32.totalorder %s2156_s17, %s2306_s3 }
 0x237   :  { %p2162_p9 = pnand %p2160_p8, %p2157_p7 }
 0x239   :  { %2165 = shalt.err (!%p2162_p9)
}
 0x23a   :  { %s2179_s22 = smov 768   ;;  %s2180_s23 = smov 48  }
 0x23b   :  { %1576 = dma.vmem_to_hbm [thread:$0]  %s1571_s13, 1536, %s2306_s3, [#allocation4], %s2179_s22, %s2179_s22, %s2180_s23  }
 0x23c   :  { %2170 = dma.done.wait [#allocation4], 1536  }
 0x23d   :  { %2171 = vsyncadd [#allocation4], 4294965760 }
 0x23e   :  { %1580 = vsyncpa [#allocation3], 1 }
 0x23f   :  { %1581 = vsyncpa [#allocation6], 1 }
 0x240   :  { %1582 = vsyncpa [#allocation4], 1 }

</bundles_post_ra>
